<compile_context>
chip_gen: v7x
topology: tpu7x:2x2x1
jax: 0.10.0
libtpu: 0.0.40
codegen_flags: <defaults>
</compile_context>

<pallas_src>
import jax
import jax.numpy as jnp
from jax.experimental import pallas as pl
from jax.experimental.pallas import tpu as pltpu


def _reward_mlp_kernel(x_ref, w1_ref, b1_ref, w2_ref, b2_ref, w3_ref, b3_ref,
                       w4t_ref, b4_ref, o_ref):
    """One batch tile of the MLP forward.  Batch is mapped to TPU lanes.

    RAGGED-TAIL INVARIANT: the last grid step may cover fewer than tile_n
    valid samples; the extra lanes hold unspecified VMEM data.  Every op below
    is strictly per-lane along the batch axis (no cross-batch reduction, no
    full-block scalar derived from the tile), and Pallas writes back only the
    valid lanes of the partial output block.  Keep it that way when editing.
    """
    # x arrives in its natural (tile_n, 2) layout; the tiny transpose runs on
    # the otherwise-idle XLU and replaces the former host-side x.T.
    xt = x_ref[...].T                                     # (2, tile_n) f32

    # Layer 1: contraction depth is only 2 -> two VPU broadcast-FMAs, skip MXU.
    w1 = w1_ref[...]                                      # (h0, 2)
    h = w1[:, 0:1] * xt[0:1, :] + w1[:, 1:2] * xt[1:2, :] + b1_ref[...]
    h = jnp.maximum(h, 0.0)                               # (h0, tile_n)

    # Layers 2-3: W @ H on the MXU, batch stays on lanes (lane-dense).
    # Activations are cast to the weight dtype so an optional bf16 weight path
    # uses the MXU natively; accumulation stays f32.
    h = jnp.dot(w2_ref[...], h.astype(w2_ref.dtype),
                preferred_element_type=jnp.float32) + b2_ref[...]
    h = jnp.maximum(h, 0.0)                               # (h1, tile_n)

    h = jnp.dot(w3_ref[...], h.astype(w3_ref.dtype),
                preferred_element_type=jnp.float32) + b3_ref[...]
    h = jnp.maximum(h, 0.0)                               # (h2, tile_n)

    # Layer 4: a (1, h2) matmul would waste an entire MXU pass, so do it as a
    # VPU multiply + sublane (axis 0) reduction instead.
    z = jnp.sum(w4t_ref[...] * h, axis=0, keepdims=True) + b4_ref[...]  # (1, tile_n)

    # Softplus(z) = log(1 + exp(z)), numerically stable form.
    # (exp/log only: guaranteed-supported transcendentals.)
    o_ref[...] = jnp.maximum(z, 0.0) + jnp.log(1.0 + jnp.exp(-jnp.abs(z)))


def _round_up(v, m):
    return ((v + m - 1) // m) * m


def _num_tensorcores():
    """Best-effort TensorCore count.  Falls back to 1 (v5e/v6e behaviour),
    which simply disables the 'keep the grid shardable' cap."""
    try:
        info = pltpu.get_tpu_info()
        for name in ("num_cores", "core_count", "num_tensorcores",
                     "tensor_cores_per_chip", "tensorcores_per_chip"):
            v = getattr(info, name, None)
            if isinstance(v, int) and v > 0:
                return v
    except Exception:
        pass
    v = getattr(jax.devices()[0], "num_cores", None)
    return v if isinstance(v, int) and v > 0 else 1


def reward_network_forward(x, params, *, tile_n=8192, matmul_dtype=jnp.float32):
    """RewardNetwork forward pass.  x: (N, 2) f32 -> (N, 1) f32.

    tile_n: batch-tile width (lanes); large tiles amortize per-step overhead.
    matmul_dtype: dtype for the two MXU layers (w2/w3).  jnp.bfloat16 is a
    modest, nearly-free win on v6e/v7x; keep f32 on v5e or when exact f32
    numerics are required (layer 1, ReLUs and softplus always stay f32).
    """
    (w1, b1), (w2, b2), (w3, b3), (w4, b4) = params
    n, in_dim = x.shape
    assert in_dim == 2, "RewardNetwork expects 2-D (speed, gap) state features"

    # ---- tile selection --------------------------------------------------
    tile_n = int(max(128, min(int(tile_n), 16384)))      # VMEM-safe range
    tile_n = _round_up(tile_n, 128)
    tile_n = min(tile_n, _round_up(n, 128))              # never exceed batch
    cores = _num_tensorcores()
    if cores > 1:
        # Keep >= `cores` grid steps so the "parallel" axis can shard across
        # TensorCores (v7x).  Single-TC chips skip this entirely.
        per_core = max(128, _round_up(pl.cdiv(n, cores), 128))
        tile_n = min(tile_n, per_core)
    grid = (pl.cdiv(n, tile_n),)

    # Tiny weight-side prep (a few hundred bytes; negligible next to x):
    # layer-4 weight transposed to (h2, 1) for the sublane reduction, optional
    # bf16 cast of the two MXU-layer weights.
    w2k = w2.astype(matmul_dtype)
    w3k = w3.astype(matmul_dtype)
    w4t = w4.T

    # Weights/biases stay resident in VMEM across all grid steps (index map is
    # constant, so Pallas DMAs them only once).
    resident = lambda a: pl.BlockSpec(a.shape, lambda i: (0, 0))

    h0, h1, h2 = w1.shape[0], w2.shape[0], w3.shape[0]
    flops = 2 * n * (2 * h0 + h0 * h1 + h1 * h2 + h2)
    param_bytes = sum(int(a.size) * a.dtype.itemsize
                      for a in (w1, b1, w2k, b2, w3k, b3, w4t, b4))
    cost = pl.CostEstimate(flops=int(flops), transcendentals=2 * n,
                           bytes_accessed=int(n * 12 + param_bytes))

    out = pl.pallas_call(
        _reward_mlp_kernel,
        out_shape=jax.ShapeDtypeStruct((1, n), jnp.float32),
        grid_spec=pltpu.PrefetchScalarGridSpec(
            num_scalar_prefetch=0,
            grid=grid,
            in_specs=[
                # x fed in its natural (N, 2) layout -- no host-side transpose.
                pl.BlockSpec((tile_n, 2), lambda i: (i, 0)),
                resident(w1), resident(b1),
                resident(w2k), resident(b2),
                resident(w3k), resident(b3),
                resident(w4t), resident(b4),
            ],
            out_specs=pl.BlockSpec((1, tile_n), lambda i: (0, i)),
        ),
        compiler_params=pltpu.CompilerParams(
            dimension_semantics=("parallel",)),
        cost_estimate=cost,
    )(x, w1, b1, w2k, b2, w3k, b3, w4t, b4)

    # (1, N) -> (N, 1): identical row-major element order, i.e. a free
    # metadata reshape (no data movement, unlike a transpose).
    return out.reshape(n, 1)


def init_reward_params(key, layers):
    """Deterministic init mirroring nn.Linear's U(-1/sqrt(fan_in), 1/sqrt(fan_in)).

    Weights use PyTorch layout (out_features, in_features); biases are
    (out_features, 1) for in-kernel broadcasting against (out, tile_n).
    """
    dims = [2, layers[0], layers[1], layers[2], 1]
    params = []
    for idx in range(4):
        fan_in, fan_out = dims[idx], dims[idx + 1]
        key, kw, kb = jax.random.split(key, 3)
        bound = 1.0 / float(fan_in) ** 0.5
        w = jax.random.uniform(kw, (fan_out, fan_in), jnp.float32, -bound, bound)
        b = jax.random.uniform(kb, (fan_out, 1), jnp.float32, -bound, bound)
        params.append((w, b))
    return params


def _reference_forward(x, params):
    """Pure-JAX reference for correctness checking."""
    h = x
    for i, (w, b) in enumerate(params):
        h = h @ w.T + b.T
        if i < 3:
            h = jnp.maximum(h, 0.0)
    return jnp.maximum(h, 0.0) + jnp.log1p(jnp.exp(-jnp.abs(h)))


if __name__ == "__main__":
    # TODO(synk): the PyTorch `grad` flag / torch.no_grad() is autodiff
    # bookkeeping only (forward math identical) and `self.mdp` is unused in
    # forward -- neither needs a kernel equivalent.
    key = jax.random.PRNGKey(0)
    k_params, k_x1, k_x2 = jax.random.split(key, 3)

    layers = [32, 32, 16]              # MLP hidden sizes from __init__
    params = init_reward_params(k_params, layers)

    # Tiny batch of (speed, gap) states: single ragged edge block.
    x_small = jax.random.normal(k_x1, (8, 2), jnp.float32)
    out_small = jax.block_until_ready(reward_network_forward(x_small, params))
    ref_small = _reference_forward(x_small, params)
    assert out_small.shape == (8, 1)
    assert jnp.allclose(out_small, ref_small, atol=1e-5, rtol=1e-5)

    # Larger ragged batch with a deliberately small tile: exercises a
    # multi-step "parallel" grid plus the masked tail block.
    x_big = jax.random.normal(k_x2, (300, 2), jnp.float32)
    out_big = jax.block_until_ready(
        reward_network_forward(x_big, params, tile_n=128))
    ref_big = _reference_forward(x_big, params)
    assert out_big.shape == (300, 1)
    assert jnp.allclose(out_big, ref_big, atol=1e-5, rtol=1e-5)

    # Default (large-tile) path on the same data.
    out_big2 = jax.block_until_ready(reward_network_forward(x_big, params))
    assert jnp.allclose(out_big2, ref_big, atol=1e-5, rtol=1e-5)

    print("KERNEL_OK")
</pallas_src>

<mosaic_0001>
module attributes {stable_mosaic.version = 11 : i64} {
  func.func @_reward_mlp_kernel(%arg0: i32, %arg1: memref<128x2xf32, #tpu.memory_space<vmem>>, %arg2: memref<32x2xf32, #tpu.memory_space<vmem>>, %arg3: memref<32x1xf32, #tpu.memory_space<vmem>>, %arg4: memref<32x32xf32, #tpu.memory_space<vmem>>, %arg5: memref<32x1xf32, #tpu.memory_space<vmem>>, %arg6: memref<16x32xf32, #tpu.memory_space<vmem>>, %arg7: memref<16x1xf32, #tpu.memory_space<vmem>>, %arg8: memref<16x1xf32, #tpu.memory_space<vmem>>, %arg9: memref<1x1xf32, #tpu.memory_space<vmem>>, %arg10: memref<1x128xf32, #tpu.memory_space<vmem>>) attributes {dimension_semantics = [#tpu.dimension_semantics<parallel>], iteration_bounds = array<i64: 1>, scalar_prefetch = 0 : i64, scratch_operands = 0 : i64, tpu.core_type = #tpu.core_type<tc>, window_params = [{transform_indices = @transform_0, window_bounds = array<i64: 128, 2>}, {pipeline_mode = #tpu.pipeline_mode<synchronous>, transform_indices = @transform_1, window_bounds = array<i64: 32, 2>}, {pipeline_mode = #tpu.pipeline_mode<synchronous>, transform_indices = @transform_2, window_bounds = array<i64: 32, 1>}, {pipeline_mode = #tpu.pipeline_mode<synchronous>, transform_indices = @transform_3, window_bounds = array<i64: 32, 32>}, {pipeline_mode = #tpu.pipeline_mode<synchronous>, transform_indices = @transform_4, window_bounds = array<i64: 32, 1>}, {pipeline_mode = #tpu.pipeline_mode<synchronous>, transform_indices = @transform_5, window_bounds = array<i64: 16, 32>}, {pipeline_mode = #tpu.pipeline_mode<synchronous>, transform_indices = @transform_6, window_bounds = array<i64: 16, 1>}, {pipeline_mode = #tpu.pipeline_mode<synchronous>, transform_indices = @transform_7, window_bounds = array<i64: 16, 1>}, {pipeline_mode = #tpu.pipeline_mode<synchronous>, transform_indices = @transform_8, window_bounds = array<i64: 1, 1>}, {transform_indices = @transform_9, window_bounds = array<i64: 1, 128>}]} {
    %c0 = arith.constant 0 : index
    %c0_0 = arith.constant 0 : index
    %0 = vector.load %arg1[%c0, %c0_0] : memref<128x2xf32, #tpu.memory_space<vmem>>, vector<128x2xf32>
    %1 = tpu.transpose %0, [1, 0] : vector<128x2xf32> -> vector<2x128xf32>
    %c0_1 = arith.constant 0 : index
    %c0_2 = arith.constant 0 : index
    %2 = vector.load %arg2[%c0_1, %c0_2] : memref<32x2xf32, #tpu.memory_space<vmem>>, vector<32x2xf32>
    %3 = vector.extract_strided_slice %2 {offsets = [0, 0], sizes = [32, 1], strides = [1, 1]} : vector<32x2xf32> to vector<32x1xf32>
    %4 = vector.extract_strided_slice %1 {offsets = [0, 0], sizes = [1, 128], strides = [1, 1]} : vector<2x128xf32> to vector<1x128xf32>
    %5 = vector.broadcast %3 : vector<32x1xf32> to vector<32x128xf32>
    %6 = vector.broadcast %4 : vector<1x128xf32> to vector<32x128xf32>
    %7 = arith.mulf %5, %6 : vector<32x128xf32>
    %8 = vector.extract_strided_slice %2 {offsets = [0, 1], sizes = [32, 1], strides = [1, 1]} : vector<32x2xf32> to vector<32x1xf32>
    %9 = vector.extract_strided_slice %1 {offsets = [1, 0], sizes = [1, 128], strides = [1, 1]} : vector<2x128xf32> to vector<1x128xf32>
    %10 = vector.broadcast %8 : vector<32x1xf32> to vector<32x128xf32>
    %11 = vector.broadcast %9 : vector<1x128xf32> to vector<32x128xf32>
    %12 = arith.mulf %10, %11 : vector<32x128xf32>
    %13 = arith.addf %7, %12 : vector<32x128xf32>
    %c0_3 = arith.constant 0 : index
    %c0_4 = arith.constant 0 : index
    %14 = vector.load %arg3[%c0_3, %c0_4] : memref<32x1xf32, #tpu.memory_space<vmem>>, vector<32x1xf32>
    %15 = vector.broadcast %14 : vector<32x1xf32> to vector<32x128xf32>
    %16 = arith.addf %13, %15 : vector<32x128xf32>
    %cst = arith.constant 0.000000e+00 : f32
    %17 = vector.broadcast %cst : f32 to vector<32x128xf32>
    %18 = arith.maximumf %16, %17 : vector<32x128xf32>
    %c0_5 = arith.constant 0 : index
    %c0_6 = arith.constant 0 : index
    %19 = vector.load %arg4[%c0_5, %c0_6] : memref<32x32xf32, #tpu.memory_space<vmem>>, vector<32x32xf32>
    %cst_7 = arith.constant dense<0.000000e+00> : vector<32x128xf32>
    %20 = tpu.matmul %19, %18, %cst_7 {dimension_numbers = #tpu.dot_dimension_numbers<[1], [0], [0], [1], [0, 0, 1, 1], [], []>} : vector<32x32xf32>, vector<32x128xf32>, vector<32x128xf32> -> vector<32x128xf32>
    %c0_8 = arith.constant 0 : index
    %c0_9 = arith.constant 0 : index
    %21 = vector.load %arg5[%c0_8, %c0_9] : memref<32x1xf32, #tpu.memory_space<vmem>>, vector<32x1xf32>
    %22 = vector.broadcast %21 : vector<32x1xf32> to vector<32x128xf32>
    %23 = arith.addf %20, %22 : vector<32x128xf32>
    %cst_10 = arith.constant 0.000000e+00 : f32
    %24 = vector.broadcast %cst_10 : f32 to vector<32x128xf32>
    %25 = arith.maximumf %23, %24 : vector<32x128xf32>
    %c0_11 = arith.constant 0 : index
    %c0_12 = arith.constant 0 : index
    %26 = vector.load %arg6[%c0_11, %c0_12] : memref<16x32xf32, #tpu.memory_space<vmem>>, vector<16x32xf32>
    %cst_13 = arith.constant dense<0.000000e+00> : vector<16x128xf32>
    %27 = tpu.matmul %26, %25, %cst_13 {dimension_numbers = #tpu.dot_dimension_numbers<[1], [0], [0], [1], [0, 0, 1, 1], [], []>} : vector<16x32xf32>, vector<32x128xf32>, vector<16x128xf32> -> vector<16x128xf32>
    %c0_14 = arith.constant 0 : index
    %c0_15 = arith.constant 0 : index
    %28 = vector.load %arg7[%c0_14, %c0_15] : memref<16x1xf32, #tpu.memory_space<vmem>>, vector<16x1xf32>
    %29 = vector.broadcast %28 : vector<16x1xf32> to vector<16x128xf32>
    %30 = arith.addf %27, %29 : vector<16x128xf32>
    %cst_16 = arith.constant 0.000000e+00 : f32
    %31 = vector.broadcast %cst_16 : f32 to vector<16x128xf32>
    %32 = arith.maximumf %30, %31 : vector<16x128xf32>
    %c0_17 = arith.constant 0 : index
    %c0_18 = arith.constant 0 : index
    %33 = vector.load %arg8[%c0_17, %c0_18] : memref<16x1xf32, #tpu.memory_space<vmem>>, vector<16x1xf32>
    %34 = vector.broadcast %33 : vector<16x1xf32> to vector<16x128xf32>
    %35 = arith.mulf %34, %32 : vector<16x128xf32>
    %cst_19 = arith.constant dense<0.000000e+00> : vector<128xf32>
    %36 = vector.multi_reduction <add>, %35, %cst_19 [0] : vector<16x128xf32> to vector<128xf32>
    %37 = vector.shape_cast %36 : vector<128xf32> to vector<1x128xf32>
    %c0_20 = arith.constant 0 : index
    %c0_21 = arith.constant 0 : index
    %38 = vector.load %arg9[%c0_20, %c0_21] : memref<1x1xf32, #tpu.memory_space<vmem>>, vector<1x1xf32>
    %39 = vector.broadcast %38 : vector<1x1xf32> to vector<1x128xf32>
    %40 = arith.addf %37, %39 : vector<1x128xf32>
    %cst_22 = arith.constant 0.000000e+00 : f32
    %41 = vector.broadcast %cst_22 : f32 to vector<1x128xf32>
    %42 = arith.maximumf %40, %41 : vector<1x128xf32>
    %43 = math.absf %40 : vector<1x128xf32>
    %cst_23 = arith.constant 0.000000e+00 : f32
    %44 = vector.broadcast %cst_23 : f32 to vector<1x128xf32>
    %45 = arith.subf %44, %43 : vector<1x128xf32>
    %46 = math.exp %45 : vector<1x128xf32>
    %cst_24 = arith.constant 1.000000e+00 : f32
    %47 = vector.broadcast %cst_24 : f32 to vector<1x128xf32>
    %48 = arith.addf %47, %46 : vector<1x128xf32>
    %49 = math.log %48 : vector<1x128xf32>
    %50 = arith.addf %42, %49 : vector<1x128xf32>
    %c0_25 = arith.constant 0 : index
    %c0_26 = arith.constant 0 : index
    %51 = vector.load %arg10[%c0_25, %c0_26] : memref<1x128xf32, #tpu.memory_space<vmem>>, vector<1x128xf32>
    tpu.vector_store %arg10[%c0_25, %c0_26], %50 {strides = array<i32>} : memref<1x128xf32, #tpu.memory_space<vmem>>, vector<1x128xf32>,
    return
  }
  func.func @transform_0(%arg0: i32) -> (i32, i32) {
    %c0_i32 = arith.constant 0 : i32
    %c0_i32_0 = arith.constant 0 : i32
    return %arg0, %c0_i32 : i32, i32
  }
  func.func @transform_1(%arg0: i32) -> (i32, i32) {
    %c0_i32 = arith.constant 0 : i32
    %c0_i32_0 = arith.constant 0 : i32
    %c0_i32_1 = arith.constant 0 : i32
    return %c0_i32, %c0_i32_0 : i32, i32
  }
  func.func @transform_2(%arg0: i32) -> (i32, i32) {
    %c0_i32 = arith.constant 0 : i32
    %c0_i32_0 = arith.constant 0 : i32
    %c0_i32_1 = arith.constant 0 : i32
    return %c0_i32, %c0_i32_0 : i32, i32
  }
  func.func @transform_3(%arg0: i32) -> (i32, i32) {
    %c0_i32 = arith.constant 0 : i32
    %c0_i32_0 = arith.constant 0 : i32
    %c0_i32_1 = arith.constant 0 : i32
    return %c0_i32, %c0_i32_0 : i32, i32
  }
  func.func @transform_4(%arg0: i32) -> (i32, i32) {
    %c0_i32 = arith.constant 0 : i32
    %c0_i32_0 = arith.constant 0 : i32
    %c0_i32_1 = arith.constant 0 : i32
    return %c0_i32, %c0_i32_0 : i32, i32
  }
  func.func @transform_5(%arg0: i32) -> (i32, i32) {
    %c0_i32 = arith.constant 0 : i32
    %c0_i32_0 = arith.constant 0 : i32
    %c0_i32_1 = arith.constant 0 : i32
    return %c0_i32, %c0_i32_0 : i32, i32
  }
  func.func @transform_6(%arg0: i32) -> (i32, i32) {
    %c0_i32 = arith.constant 0 : i32
    %c0_i32_0 = arith.constant 0 : i32
    %c0_i32_1 = arith.constant 0 : i32
    return %c0_i32, %c0_i32_0 : i32, i32
  }
  func.func @transform_7(%arg0: i32) -> (i32, i32) {
    %c0_i32 = arith.constant 0 : i32
    %c0_i32_0 = arith.constant 0 : i32
    %c0_i32_1 = arith.constant 0 : i32
    return %c0_i32, %c0_i32_0 : i32, i32
  }
  func.func @transform_8(%arg0: i32) -> (i32, i32) {
    %c0_i32 = arith.constant 0 : i32
    %c0_i32_0 = arith.constant 0 : i32
    %c0_i32_1 = arith.constant 0 : i32
    return %c0_i32, %c0_i32_0 : i32, i32
  }
  func.func @transform_9(%arg0: i32) -> (i32, i32) {
    %c0_i32 = arith.constant 0 : i32
    %c0_i32_0 = arith.constant 0 : i32
    return %c0_i32, %arg0 : i32, i32
  }
}

</mosaic_0001>

<bundles_post_ra>
// kernel: tpu_custom_call.1
= control target key start
LH: loop header
LB: loop body
LE: loop exit
PB: predicated region body
PF: predicated region fallthrough
CT: control target
= control target key end

     0   :  { %s752_s0 = inlined_call_operand.vmem [shape: f32[8,2], index: 0, kind: input, shape index: {}]   ;;  %s753_s1 = inlined_call_operand.vmem [shape: f32[32,2], index: 1, kind: input, shape index: {}]   ;;  %s754_s2 = inlined_call_operand.vmem [shape: f32[32,1], index: 2, kind: input, shape index: {}]   ;;  %s755_s3 = inlined_call_operand.vmem [shape: f32[32,32], index: 3, kind: input, shape index: {}]   ;;  %s756_s4 = inlined_call_operand.vmem [shape: f32[32,1], index: 4, kind: input, shape index: {}]   ;;  %s757_s5 = inlined_call_operand.vmem [shape: f32[16,32], index: 5, kind: input, shape index: {}]   ;;  %s758_s6 = inlined_call_operand.vmem [shape: f32[16,1], index: 6, kind: input, shape index: {}]   ;;  %s759_s7 = inlined_call_operand.vmem [shape: f32[16,1], index: 7, kind: input, shape index: {}]   ;;  %s760_s8 = inlined_call_operand.<no memory space> [shape: f32[1,1], index: 8, kind: input, shape index: {}]   ;;  %s761_s9 = inlined_call_operand.hbm [shape: f32[1,8], index: 9, kind: output, shape index: {}]  }
   0x1   :  { %v14_v0 = vstv %s760_s8 }
   0x2   :  { %15 = vst [vmem:[#allocation2] sm:$0x1] %v14_v0 }
   0x3   :  { %v85_v1 = vld [vmem:[%s753_s1 + $0x10] sm:$0xff]  ;;  %v83_v2 = vld [vmem:[%s753_s1] sm:$0xff]  ;;  %v556_v3 = vmov 1   ;;  %v84_v4 = vld [vmem:[%s753_s1 + $0x8] sm:$0xff]  ;;  %v557_v5 = vmov 0  }
   0x4   :  { %524 = vset.pattern.permute.xlu0 %v556_v3  ;;  %522 = vset.pattern.permute.xlu1 %v556_v3  ;;  %v86_v6 = vld [vmem:[%s753_s1 + $0x18] sm:$0xff] }
   0x5   :  { %124 = vperm.xlu0 %524, %v85_v1   ;;  %116 = vperm.xlu1 %522, %v83_v2  }
   0x9   :  { %525 = vset.pattern.permute.xlu0 %v557_v5  ;;  %120 = vperm.xlu1 %522, %v84_v4  }
   0xa   :  { %89 = vperm.xlu0 %525, %v83_v2  }
   0xd   :  { %523 = vset.pattern.permute.xlu1 %v557_v5 }
   0xe   :  { %94 = vperm.xlu0 %525, %v84_v4   ;;  %104 = vperm.xlu1 %523, %v86_v6  }
   0xf   :  { %16 = vsyncpa [#allocation4], 0  ;;  %v144_v7 = vld [vmem:[%s754_s2 + $0x8] sm:$0xff]  ;;  %v143_v8 = vld [vmem:[%s754_s2] sm:$0xff]  ;;  %vm203_vm0 = vcmask 261120   ;;  %v107_v44 = vlaneseq }
  0x10   :  { %v145_v9 = vld [vmem:[%s754_s2 + $0x10] sm:$0xff]  ;;  %v146_v10 = vld [vmem:[%s754_s2 + $0x18] sm:$0xff]  ;;  %v179_v11 = vld [vmem:[%s756_s4] sm:$0xff] }
  0x11   :  { %v180_v12 = vld [vmem:[%s756_s4 + $0x8] sm:$0xff]  ;;  %v181_v13 = vld [vmem:[%s756_s4 + $0x10] sm:$0xff]  ;;  %v182_v14 = vld [vmem:[%s756_s4 + $0x18] sm:$0xff]  ;;  %v712_v46 = vshrl.u32 %v107_v44, 7 }
  0x12   :  { %99 = vperm.xlu0 %525, %v85_v1   ;;  %526 = vset.pattern.permute.xlu1 %v556_v3  ;;  %v307_v15 = vld [vmem:[%s758_s6] sm:$0xff]  ;;  %v308_v17 = vld [vmem:[%s758_s6 + $0x8] sm:$0xff]  ;;  %v37_v20 = vld [vmem:[%s752_s0 + $0x10] sm:$0xff] }
  0x13   :  { %128 = vperm.xlu1 %526, %v86_v6   ;;  %v35_v16 = vld [vmem:[%s752_s0] sm:$0xff]  ;;  %v36_v18 = vld [vmem:[%s752_s0 + $0x8] sm:$0xff]  ;;  %v38_v22 = vld [vmem:[%s752_s0 + $0x18] sm:$0xff]  ;;  %v109_v49 = vsub.s32 0, %v712_v46  ;;  %v133_v50 = vsub.s32 1, %v712_v46 }
  0x14   :  { %v402_v19 = vld [vmem:[%s759_s7] sm:$0xff]  ;;  %v403_v21 = vld [vmem:[%s759_s7 + $0x8] sm:$0xff]  ;;  %v41_v27 = vld [vmem:[%s752_s0 + $0x30] sm:$0xff] }
  0x15   :  { %v423_v23 = vld [vmem:[#allocation2] sm:$0x1]  ;;  %v40_v25 = vld [vmem:[%s752_s0 + $0x28] sm:$0xff]  ;;  %v42_v28 = vld [vmem:[%s752_s0 + $0x38] sm:$0xff] }
  0x16   :  { %154 = vperm.xlu0 %525, %v144_v7   ;;  %v39_v24 = vld [vmem:[%s752_s0 + $0x20] sm:$0xff]  ;;  %v44_v30 = vld [vmem:[%s752_s0 + $0x48] sm:$0xff]  ;;  %v45_v31 = vld [vmem:[%s752_s0 + $0x50] sm:$0xff] }
  0x17   :  { %527 = vset.pattern.permute.xlu1 %v557_v5  ;;  %v175_v26 = vld [vmem:[%s755_s3] sm:$0xff]  ;;  %v46_v32 = vld [vmem:[%s752_s0 + $0x58] sm:$0xff]  ;;  %v48_v34 = vld [vmem:[%s752_s0 + $0x68] sm:$0xff] }
  0x18   :  { %149 = vperm.xlu1 %527, %v143_v8   ;;  %486 = vmatprep.mubr.msk.f32.mxu0 %vm203_vm0, %v175_v26  ;;  %v43_v29 = vld [vmem:[%s752_s0 + $0x40] sm:$0xff]  ;;  %v49_v35 = vld [vmem:[%s752_s0 + $0x70] sm:$0xff]  ;;  %v50_v36 = vld [vmem:[%s752_s0 + $0x78] sm:$0xff] }
  0x19   :  { %v47_v33 = vld [vmem:[%s752_s0 + $0x60] sm:$0xff] }
  0x1c   :  { %159 = vperm.xlu1 %527, %v145_v9  }
  0x20   :  { %164 = vperm.xlu1 %527, %v146_v10  }
  0x24   :  { %185 = vperm.xlu1 %527, %v179_v11  }
  0x28   :  { %190 = vperm.xlu1 %527, %v180_v12  }
  0x2c   :  { %195 = vperm.xlu1 %527, %v181_v13  }
  0x30   :  { %200 = vperm.xlu1 %527, %v182_v14   ;;  %v176_v14 = vld [vmem:[%s755_s3 + $0x8] sm:$0xff] }
  0x34   :  { %311 = vperm.xlu1 %527, %v307_v15   ;;  %51 = vxpose.xlu0.b32.start [1/16] (narrow) %v35_v16, 8  ;;  %v177_v15 = vld [vmem:[%s755_s3 + $0x10] sm:$0xff]  ;;  %v178_v16 = vld [vmem:[%s755_s3 + $0x18] sm:$0xff] }
  0x38   :  { %316 = vperm.xlu1 %527, %v308_v17   ;;  %52 = vxpose.xlu0.b32.cont [2/16] (narrow) %v36_v18, 8  ;;  %v305_v17 = vld [vmem:[%s757_s5] sm:$0xff] }
  0x39   :  { %500 = vmatprep.mubr.msk.f32.mxu1 %vm203_vm0, %v305_v17 }
  0x3c   :  { %406 = vperm.xlu1 %527, %v402_v19   ;;  %53 = vxpose.xlu0.b32.cont [3/16] (narrow) %v37_v20, 8 }
  0x40   :  { %411 = vperm.xlu1 %527, %v403_v21   ;;  %54 = vxpose.xlu0.b32.cont [4/16] (narrow) %v38_v22, 8 }
  0x44   :  { %426 = vperm.xlu1 %527, %v423_v23   ;;  %55 = vxpose.xlu0.b32.cont [5/16] (narrow) %v39_v24, 8 }
  0x48   :  { %56 = vxpose.xlu0.b32.cont [6/16] (narrow) %v40_v25, 8 }
  0x4c   :  { %57 = vxpose.xlu0.b32.cont [7/16] (narrow) %v41_v27, 8 }
  0x50   :  { %58 = vxpose.xlu0.b32.cont [8/16] (narrow) %v42_v28, 8 }
  0x54   :  { %59 = vxpose.xlu0.b32.cont [9/16] (narrow) %v43_v29, 8 }
  0x58   :  { %60 = vxpose.xlu0.b32.cont [10/16] (narrow) %v44_v30, 8 }
  0x5c   :  { %61 = vxpose.xlu0.b32.cont [11/16] (narrow) %v45_v31, 8 }
  0x60   :  { %62 = vxpose.xlu0.b32.cont [12/16] (narrow) %v46_v32, 8 }
  0x64   :  { %63 = vxpose.xlu0.b32.cont [13/16] (narrow) %v47_v33, 8 }
  0x68   :  { %64 = vxpose.xlu0.b32.cont [14/16] (narrow) %v48_v34, 8 }
  0x6c   :  { %65 = vxpose.xlu0.b32.cont [15/16] (narrow) %v49_v35, 8 }
  0x70   :  { %66 = vxpose.xlu0.b32.end [16/16] (narrow) %v50_v36, 8  ;;  %v306_v36 = vld [vmem:[%s757_s5 + $0x8] sm:$0xff]  ;;  %s558_s5 = smov [#allocation3]  }
  0x71   :  { %s450_s29 = sshll.u32 %s558_s5, 4  ;;  %s451_s29 = int_to_ptr.vmem [resolvable:$true] %s450_s29 }
  0x72   :  { %s532_s30 = scalar_lea.vmem %s451_s29, 16  ;;  %s536_s10 = scalar_lea.vmem %s451_s29, 32 }
  0x73   :  { %p533_p0 = scmp.ne.s32.totalorder %s451_s29, %s532_s30  ;;  %p537_p1 = scmp.lt.s32.totalorder %s451_s29, %s451_s29 }
  0x74   :  { %p538_p2 = scmp.lt.s32.totalorder %s536_s10, %s532_s30 }
  0x76   :  { %p539_p3 = por %p538_p2, %p537_p1 }
  0x78   :  { %p540_p4 = pnand %p539_p3, %p533_p0 }
  0x84   :  { %v117_v37 = vpop.permute.xlu1 %116  ;;  %v125_v38 = vpop.permute.xlu0 %124 }
  0x88   :  { %v121_v39 = vpop.permute.xlu1 %120 }
  0x89   :  { %v90_v40 = vpop.permute.xlu0 %89 }
  0x8d   :  { %v105_v41 = vpop.permute.xlu1 %104  ;;  %v95_v42 = vpop.permute.xlu0 %94 }
  0x91   :  { %v100_v45 = vpop.permute.xlu0 %99 }
  0x92   :  { %v129_v43 = vpop.permute.xlu1 %128 }
  0x95   :  { %v155_v48 = vpop.permute.xlu0 %154 }
  0x97   :  { %v150_v47 = vpop.permute.xlu1 %149 }
  0x9b   :  { %v160_v51 = vpop.permute.xlu1 %159 }
  0x9f   :  { %v165_v1 = vpop.permute.xlu1 %164 }
  0xa3   :  { %v186_v18 = vpop.permute.xlu1 %185 }
  0xa7   :  { %v191_v19 = vpop.permute.xlu1 %190 }
  0xab   :  { %v196_v20 = vpop.permute.xlu1 %195 }
  0xaf   :  { %v201_v26 = vpop.permute.xlu1 %200 }
  0xb4   :  { %v67_v52 = vpop.trf.xlu0 }
  0xb5   :  { %v110_v53 = vrot.slane %v67_v52, %v109_v49  ;;  %v134_v54 = vrot.slane %v67_v52, %v133_v50 }
  0xb7   :  { %v113_v55 = vmul.f32 %v110_v53, %v100_v45  ;;  %v114_v56 = vmul.f32 %v110_v53, %v105_v41  ;;  %v137_v57 = vmul.f32 %v134_v54, %v125_v38  ;;  %v138_v58 = vmul.f32 %v134_v54, %v129_v43 }
  0xb8   :  { %v111_v59 = vmul.f32 %v110_v53, %v90_v40  ;;  %v112_v60 = vmul.f32 %v110_v53, %v95_v42  ;;  %v135_v61 = vmul.f32 %v134_v54, %v117_v37  ;;  %v136_v62 = vmul.f32 %v134_v54, %v121_v39  ;;  %v312_v37 = vpop.permute.xlu1 %311 }
  0xb9   :  { %v141_v63 = vadd.f32 %v137_v57, %v113_v55  ;;  %v142_v0 = vadd.f32 %v138_v58, %v114_v56 }
  0xba   :  { %v139_v2 = vadd.f32 %v135_v61, %v111_v59  ;;  %v140_v3 = vadd.f32 %v136_v62, %v112_v60 }
  0xbb   :  { %v169_v4 = vadd.f32 %v160_v51, %v141_v63  ;;  %v170_v5 = vadd.f32 %v165_v1, %v142_v0 }
  0xbc   :  { %v167_v6 = vadd.f32 %v150_v47, %v139_v2  ;;  %v168_v7 = vadd.f32 %v155_v48, %v140_v3  ;;  %v317_v38 = vpop.permute.xlu1 %316 }
  0xbd   :  { %v173_v10 = vmax.f32 %v169_v4, 0.0  ;;  %v174_v11 = vmax.f32 %v170_v5, 0.0 }
  0xbe   :  { %v171_v8 = vmax.f32 %v167_v6, 0.0  ;;  %v172_v9 = vmax.f32 %v168_v7, 0.0 }
  0xbf   :  { %v507_v13 = vpack.c.bf16 %v174_v11, %v173_v10 }
  0xc0   :  { %v503_v12 = vpack.c.bf16 %v172_v9, %v171_v8  ;;  %v407_v39 = vpop.permute.xlu1 %406 }
  0xc2   :  { %504 = vmatprep.subr.bf16.mxu0 %v503_v12 }
  0xc3   :  { %506 = vmatpush3.bf16.msra.mxu0 %v503_v12 }
  0xc4   :  { %508 = vmatprep.subr.bf16.mxu0 %v507_v13  ;;  %v412_v45 = vpop.permute.xlu1 %411 }
  0xc7   :  { %510 = vmatpush3.bf16.msra.mxu0 %v507_v13 }
  0xc8   :  { %v427_v56 = vpop.permute.xlu1 %426 }
  0xc9   :  { %v432_v58 = vrot.slane %v427_v56, %v109_v49 }
  0xca   :  { %487 = vmatmul.mubr.msk.f32.vlgmr.msra.gmra.mrb[0].mxu0 %vm203_vm0, %v176_v14 }
  0xcb   :  { %489 = vmatprep.mubr.msk.f32.mxu0 %vm203_vm0, %v177_v15 }
  0xce   :  { %490 = vmatmul.mubr.msk.f32.gmra.mrb[2].mxu0 %vm203_vm0, %v178_v16 }
 0x19d   :  { %v488_v21 = vpop.f32.mrb[0].mxu0 }
 0x19e   :  { %v288_v22 = vadd.f32 %v488_v21, %v191_v19  ;;  %v282_v23 = vpop.f32.mrb[1].mxu0 }
 0x19f   :  { %v283_v24 = vadd.f32 %v282_v23, %v186_v18 }
 0x1a0   :  { %v302_v25 = vmax.f32 %v288_v22, 0.0 }
 0x1a1   :  { %v301_v27 = vmax.f32 %v283_v24, 0.0  ;;  %v491_v28 = vpop.f32.mrb[2].mxu0 }
 0x1a2   :  { %v298_v29 = vadd.f32 %v491_v28, %v201_v26  ;;  %v292_v30 = vpop.f32.mrb[3].mxu0 }
 0x1a3   :  { %v293_v31 = vadd.f32 %v292_v30, %v196_v20  ;;  %v511_v32 = vpack.c.bf16 %v302_v25, %v301_v27 }
 0x1a4   :  { %v304_v33 = vmax.f32 %v298_v29, 0.0 }
 0x1a5   :  { %v303_v34 = vmax.f32 %v293_v31, 0.0  ;;  %512 = vmatprep.subr.bf16.mxu1 %v511_v32 }
 0x1a6   :  { %514 = vmatpush3.bf16.msra.mxu1 %v511_v32 }
 0x1a7   :  { %v515_v35 = vpack.c.bf16 %v304_v33, %v303_v34 }
 0x1a9   :  { %516 = vmatprep.subr.bf16.mxu1 %v515_v35 }
 0x1aa   :  { %518 = vmatpush3.bf16.msra.mxu1 %v515_v35 }
 0x1ad   :  { %501 = vmatmul.mubr.msk.f32.vlgmr.msra.gmra.mrb[0].mxu1 %vm203_vm0, %v306_v36 }
 0x280   :  { %v502_v40 = vpop.f32.mrb[0].mxu1 }
 0x281   :  { %v397_v41 = vadd.f32 %v502_v40, %v317_v38  ;;  %v391_v42 = vpop.f32.mrb[1].mxu1 }
 0x282   :  { %v392_v43 = vadd.f32 %v391_v42, %v312_v37 }
 0x283   :  { %v401_v44 = vmax.f32 %v397_v41, 0.0 }
 0x284   :  { %v400_v47 = vmax.f32 %v392_v43, 0.0 }
 0x285   :  { %v415_v48 = vmul.f32 %v412_v45, %v401_v44 }
 0x286   :  { %v414_v50 = vmul.f32 %v407_v39, %v400_v47 }
 0x288   :  { %v416_v51 = vadd.f32 %v415_v48, %v414_v50 }
 0x28a   :  { %v417_v52 = vrot.slane %v416_v51, 4 }
 0x28c   :  { %v418_v53 = vadd.f32 %v417_v52, %v416_v51 }
 0x28e   :  { %v419_v54 = vrot.slane %v418_v53, 2 }
 0x290   :  { %v420_v55 = vadd.f32 %v419_v54, %v418_v53 }
 0x292   :  { %v421_v57 = vrot.slane %v420_v55, 1 }
 0x294   :  { %v422_v59 = vadd.f32 %v421_v57, %v420_v55 }
 0x296   :  { %v433_v60 = vadd.f32 %v432_v58, %v422_v59 }
 0x298   :  { %v435_v61 = vand.u32 2147483647, %v433_v60  ;;  %v434_v3 = vmax.f32 %v433_v60, 0.0 }
 0x29a   :  { %v436_v62 = vsub.f32 0.0, %v435_v61 }
 0x29c   :  { %v437_v63 = vmul.f32 1.442695, %v436_v62 }
 0x29e   :  { %528 = vpow2.f32 %v437_v63 }
 0x2a8   :  { %v529_v0 = vpop.eup %528 }
 0x2a9   :  { %v439_v1 = vadd.f32 1.0, %v529_v0 }
 0x2ab   :  { %530 = vlog2.f32 %v439_v1 }
 0x2b5   :  { %v531_v2 = vpop.eup %530 }
 0x2b6   :  { %v441_v4 = vmul.f32 0.6931472, %v531_v2 }
 0x2b8   :  { %v442_v5 = vadd.f32 %v441_v4, %v434_v3 }
 0x2ba   :  { %443 = vst [vmem:[#allocation3] sm:$0x1] %v442_v5 }
 0x2bb   :  { %543 = shalt.err (!%p540_p4)
}
 0x2bc   :  { %s544_s12 = scalar_lea.hbm %s761_s9, 16 }
 0x2bd   :  { %p545_p5 = scmp.ne.s32.totalorder %s761_s9, %s544_s12  ;;  %p548_p6 = scmp.lt.u32.totalorder %s544_s12, %s761_s9 }
 0x2bf   :  { %p550_p7 = pnand %p548_p6, %p545_p5 }
 0x2c1   :  { %553 = shalt.err (!%p550_p7)
}
 0x2c2   :  { %453 = dma.vmem_to_hbm [thread:$0]  %s451_s29, 16, %s761_s9, [#allocation4]  }
 0x2c3   :  { %554 = dma.done.wait [#allocation4], 16  }
 0x2c4   :  { %555 = vsyncadd [#allocation4], 4294967280 }
 0x2c5   :  { %457 = vsyncpa [#allocation4], 1 }

</bundles_post_ra>
